<compile_context>
chip_gen: v7x
topology: tpu7x:2x2x1
jax: 0.10.0
libtpu: 0.0.40
codegen_flags: <defaults>
</compile_context>

<pallas_src>
import functools

import jax
import jax.numpy as jnp
from jax import lax
from jax.experimental import pallas as pl
from jax.experimental.pallas import tpu as pltpu

_LANE = 128
_MXU_DEPTH = 256   # contraction-depth target per matmul (v6e/v7x MXU depth);
                   # on v5e (128-deep MXU) 128 (i.e. per-tap matmuls) is ideal.


def _round_up(v, m):
  return (v + m - 1) // m * m


@functools.lru_cache(maxsize=1)
def _vmem_limit_bytes():
  """Scoped-VMEM budget: ~48 MiB on 64 MiB parts (v7x/TC), ~96 MiB on 128 MiB."""
  try:
    cap = pltpu.get_tpu_info().vmem_capacity_bytes
  except Exception:            # older jax / query unavailable -> conservative
    cap = 64 * 1024 * 1024
  return int(max(32 * 1024 * 1024,
                 min(cap - 16 * 1024 * 1024, 96 * 1024 * 1024)))


def _compiler_params():
  return pltpu.CompilerParams(dimension_semantics=("parallel",),
                              vmem_limit_bytes=_vmem_limit_bytes())


# --------------------------------------------------------------------------
# In-kernel helpers
# --------------------------------------------------------------------------
def _conv1d_same(x, w_ref, *, K, pad, mxu_dtype, tap_group, cin_pad=None):
  """Bias-free 'same' Conv1d (stride 1), channels-last, grouped-im2col MXU.

  x: (TN, L, C) any float dtype; w_ref: (K * Cp, Cout) in mxu_dtype, rows
  ordered tap-major, Cp = cin_pad or C.  The cast to mxu_dtype and the zero
  pads (channel pad to Cp, halo pad along L) happen HERE, inside VMEM, so the
  HBM-side arrays stay compact.  Taps are processed `tap_group` at a time
  (contraction depth tap_group*Cp per matmul), accumulating in f32.
  """
  TN, L, C = x.shape
  Cout = w_ref.shape[-1]
  Cp = C if cin_pad is None else cin_pad

  xm = x.astype(mxu_dtype)                               # cast before copies
  if Cp > C:
    xm = jnp.concatenate(
        [xm, jnp.zeros((TN, L, Cp - C), mxu_dtype)], axis=-1)
  if pad > 0:
    zhalo = jnp.zeros((TN, pad, Cp), mxu_dtype)
    xm = jnp.concatenate([zhalo, xm, zhalo], axis=1)     # (TN, L + 2*pad, Cp)

  acc = None
  for k0 in range(0, K, tap_group):
    kt = min(tap_group, K - k0)
    if kt == 1:
      lhs = xm[:, k0:k0 + L, :].reshape(TN * L, Cp)
    else:
      cols = jnp.concatenate(
          [xm[:, k:k + L, :] for k in range(k0, k0 + kt)], axis=-1)
      lhs = cols.reshape(TN * L, kt * Cp)
    wblk = w_ref[...] if (k0 == 0 and kt == K) else \
        w_ref[k0 * Cp:(k0 + kt) * Cp, :]
    part = jnp.dot(lhs, wblk, preferred_element_type=jnp.float32)
    acc = part if acc is None else acc + part
  return acc.reshape(TN, L, Cout)                        # f32


def _channel_stats(y):
  """Per-channel [sum ; sum-of-squares] over (TN, L) -> (2, C), f32, one pass."""
  TN, L, C = y.shape
  flat = y.reshape(TN * L, C)
  s = jnp.sum(flat, axis=0, keepdims=True)
  ss = jnp.sum(flat * flat, axis=0, keepdims=True)
  return jnp.concatenate([s, ss], axis=0)


def _bn_scale_shift(stats, g, be, *, count, eps):
  """Fold global batch stats + affine params into per-channel scale/shift (f32).

  Stats are accumulated on the BIAS-FREE conv output; the conv bias cancels
  exactly in BN(y) = y*scale + (be - mu*scale), so it is never applied.
  """
  inv_n = 1.0 / count
  mu = stats[0:1] * inv_n                        # (1, C)
  var = stats[1:2] * inv_n - mu * mu             # biased variance (training)
  inv = lax.rsqrt(var + eps)
  scale = inv * g
  shift = be - mu * scale
  return scale, shift


# --------------------------------------------------------------------------
# Kernels (all grids fully "parallel": no cross-tile accumulators)
# --------------------------------------------------------------------------
def _stage_a_kernel(x_ref, w1_ref, y1_ref, stats1_ref, *,
                    K, pad, cin_pad, mxu_dtype, tap_group):
  """conv1 (bias folded into BN1) per batch tile; emit per-tile BN1 stats."""
  y1 = _conv1d_same(x_ref[...], w1_ref, K=K, pad=pad, mxu_dtype=mxu_dtype,
                    tap_group=tap_group, cin_pad=cin_pad)
  stats1_ref[...] = _channel_stats(y1)[None]     # f32 stats before downcast
  y1_ref[...] = y1.astype(y1_ref.dtype)


def _stage_b_kernel(y1_ref, stats1_ref, g1_ref, be1_ref, w2_ref,
                    y2_ref, stats2_ref, *, K, pad, count, eps, mxu_dtype,
                    tap_group):
  """BN1 (global stats) + ReLU + conv2 per tile; emit per-tile BN2 stats."""
  scale, shift = _bn_scale_shift(stats1_ref[...], g1_ref[...], be1_ref[...],
                                 count=count, eps=eps)
  h = jnp.maximum(y1_ref[...].astype(jnp.float32) * scale[None] + shift[None],
                  0.0)
  y2 = _conv1d_same(h, w2_ref, K=K, pad=pad, mxu_dtype=mxu_dtype,
                    tap_group=tap_group)
  stats2_ref[...] = _channel_stats(y2)[None]     # f32 stats before downcast
  y2_ref[...] = y2.astype(y2_ref.dtype)


def _stage_c_kernel(y2_ref, stats2_ref, g2_ref, be2_ref, x_ref, wsk_ref,
                    bsk_ref, o_ref, *, count, eps, mxu_dtype, apply_pooling):
  """BN2 + 1x1 skip conv (from compact x) + optional MaxPool1d(2) + add + ReLU."""
  scale, shift = _bn_scale_shift(stats2_ref[...], g2_ref[...], be2_ref[...],
                                 count=count, eps=eps)
  out = y2_ref[...].astype(jnp.float32) * scale[None] + shift[None]

  # Skip path computed here (no HBM round trip for `ident`).
  x = x_ref[...].astype(mxu_dtype)               # (TN, L, cin) compact
  TN, L, Cin = x.shape
  Cpi = wsk_ref.shape[0]
  if Cpi > Cin:
    x = jnp.concatenate([x, jnp.zeros((TN, L, Cpi - Cin), mxu_dtype)], axis=-1)
  ident = jnp.dot(x.reshape(TN * L, Cpi), wsk_ref[...],
                  preferred_element_type=jnp.float32)
  ident = ident.reshape(TN, L, -1) + bsk_ref[...][None]

  if apply_pooling:
    C = out.shape[-1]
    out = jnp.max(out.reshape(TN, L // 2, 2, C), axis=2)
    ident = jnp.max(ident.reshape(TN, L // 2, 2, C), axis=2)
  o_ref[...] = jnp.maximum(out + ident, 0.0).astype(o_ref.dtype)


# --------------------------------------------------------------------------
# Host-side wrappers
# --------------------------------------------------------------------------
def prepare_params(params, *, mxu_dtype=jnp.bfloat16):
  """One-time re-layout of PyTorch-style parameters for the kernels.

  Conv weights -> (K * C_in_padded, C_out_padded) tap-major im2col matrices in
  the MXU input dtype; vectors -> (1, C_out_padded) f32 rows.  Output channels
  are padded to a multiple of 128 for lane-dense stores; conv biases b1/b2 are
  dropped (folded analytically into the BN shift).
  """
  cout, cin, K = params['w1'].shape
  cpi = _round_up(cin, _LANE)
  cpo = _round_up(cout, _LANE)

  def w_col(w, cin_pad):
    # (Cout, Cin, K) -> (K, Cin, Cout) -> zero-pad -> (K * cin_pad, cpo)
    wt = jnp.transpose(w, (2, 1, 0)).astype(jnp.float32)
    wt = jnp.pad(wt, ((0, 0), (0, cin_pad - w.shape[1]), (0, cpo - w.shape[0])))
    return wt.reshape(w.shape[2] * cin_pad, cpo).astype(mxu_dtype)

  def row(v):
    return jnp.pad(v.astype(jnp.float32), (0, cpo - v.shape[0])).reshape(1, cpo)

  wsk = jnp.transpose(params['wsk'][:, :, 0], (1, 0)).astype(jnp.float32)
  wsk = jnp.pad(wsk, ((0, cpi - cin), (0, cpo - cout))).astype(mxu_dtype)

  return dict(
      w1=w_col(params['w1'], cpi),      # conv1: input channels padded to cpi
      w2=w_col(params['w2'], cpo),      # conv2: y1 is stored cpo-wide
      g1=row(params['g1']), be1=row(params['be1']),
      g2=row(params['g2']), be2=row(params['be2']),
      wsk=wsk, bsk=row(params['bsk']))


def residual_block_forward(x_ncl, prepped, *, out_channels, kernel_size=5,
                           apply_pooling=False, eps=1e-5, batch_tile=None):
  """x_ncl: (N, C_in, L) like PyTorch Conv1d input. Returns (N, C_out, L_out)."""
  # TODO(synk): stride > 1 not implemented (module's default stride=1 covered).
  N, cin, L = x_ncl.shape
  K = kernel_size
  pad = K // 2
  cpi, cpo = prepped['wsk'].shape
  assert cpi >= cin, (cpi, cin)
  mxu_dtype = prepped['w1'].dtype
  # Inter-stage activation dtype follows the MXU dtype (bf16 in production,
  # f32 for the exactness check).  Stats are always f32.
  act_dtype = jnp.float32 if mxu_dtype == jnp.float32 else jnp.bfloat16
  assert L % 8 == 0, L
  if apply_pooling:
    assert L % 2 == 0, L
  Lout = L // 2 if apply_pooling else L
  count = float(N * L)                       # global BN sample count

  # Taps per im2col group so each matmul's contraction depth ~= _MXU_DEPTH.
  tap1 = max(1, min(K, _MXU_DEPTH // cpi))
  tap2 = max(1, min(K, _MXU_DEPTH // cpo))

  if batch_tile is None:
    # Rough per-batch-element VMEM working set of the heaviest stage (B):
    # double-buffered y1-in + y2-out, f32 h + f32 acc, halo'd mxu-dtype slab
    # plus one tap-group im2col slab.
    act_b = jnp.dtype(act_dtype).itemsize
    mxu_b = jnp.dtype(mxu_dtype).itemsize
    per_b = L * cpo * (4 * act_b + 2 * 4 + (1 + tap2) * mxu_b) \
        + 2 * pad * cpo * mxu_b
    cap = max(1, (_vmem_limit_bytes() // 3) // per_b)
    target = max(1, -(-1024 // L))           # aim for >= ~1024 rows per tile
    batch_tile = max(d for d in range(1, N + 1)
                     if N % d == 0 and d <= min(cap, target))
  TN = batch_tile
  assert N % TN == 0, (N, TN)
  num_tiles = N // TN

  # Channels-last COMPACT input: no 128-lane zero pad materialized in HBM;
  # lane padding happens inside VMEM (stages A and C).
  x = jnp.transpose(x_ncl, (0, 2, 1)).astype(jnp.float32)       # (N, L, cin)

  act_tile = lambda C, Lb=L: pl.BlockSpec((TN, Lb, C), lambda i: (i, 0, 0))
  full2d = lambda a: pl.BlockSpec(a.shape, lambda i: (0, 0))
  stats_spec = pl.BlockSpec((1, 2, cpo), lambda i: (i, 0, 0))
  stats_shape = jax.ShapeDtypeStruct((num_tiles, 2, cpo), jnp.float32)
  act_shape = jax.ShapeDtypeStruct((N, L, cpo), act_dtype)

  # ---- Stage A: conv1 per tile; per-tile BN1 partial stats ("parallel"). ----
  y1, stats1_parts = pl.pallas_call(
      functools.partial(_stage_a_kernel, K=K, pad=pad, cin_pad=cpi,
                        mxu_dtype=mxu_dtype, tap_group=tap1),
      grid=(num_tiles,),
      in_specs=[act_tile(cin), full2d(prepped['w1'])],
      out_specs=[act_tile(cpo), stats_spec],
      out_shape=[act_shape, stats_shape],
      compiler_params=_compiler_params(),
  )(x, prepped['w1'])
  stats1 = jnp.sum(stats1_parts, axis=0)           # (2, cpo) global f32 stats

  # ---- Stage B: BN1 + ReLU + conv2 per tile; per-tile BN2 partial stats. ----
  y2, stats2_parts = pl.pallas_call(
      functools.partial(_stage_b_kernel, K=K, pad=pad, count=count, eps=eps,
                        mxu_dtype=mxu_dtype, tap_group=tap2),
      grid=(num_tiles,),
      in_specs=[act_tile(cpo), full2d(stats1), full2d(prepped['g1']),
                full2d(prepped['be1']), full2d(prepped['w2'])],
      out_specs=[act_tile(cpo), stats_spec],
      out_shape=[act_shape, stats_shape],
      compiler_params=_compiler_params(),
  )(y1, stats1, prepped['g1'], prepped['be1'], prepped['w2'])
  stats2 = jnp.sum(stats2_parts, axis=0)

  # ---- Stage C: BN2 + skip conv + (pool) + add + ReLU ("parallel"). --------
  out = pl.pallas_call(
      functools.partial(_stage_c_kernel, count=count, eps=eps,
                        mxu_dtype=mxu_dtype, apply_pooling=apply_pooling),
      grid=(num_tiles,),
      in_specs=[act_tile(cpo), full2d(stats2), full2d(prepped['g2']),
                full2d(prepped['be2']), act_tile(cin), full2d(prepped['wsk']),
                full2d(prepped['bsk'])],
      out_specs=act_tile(cpo, Lout),
      out_shape=jax.ShapeDtypeStruct((N, Lout, cpo), jnp.float32),
      compiler_params=_compiler_params(),
  )(y2, stats2, prepped['g2'], prepped['be2'], x, prepped['wsk'],
    prepped['bsk'])

  return jnp.transpose(out[:, :, :out_channels], (0, 2, 1))   # (N, Cout, Lout)


# --------------------------------------------------------------------------
# Parameter init + pure-JAX reference (mirrors the PyTorch forward, training BN)
# --------------------------------------------------------------------------
def init_params(key, in_channels, out_channels, kernel_size):
  ks = jax.random.split(key, 6)
  return dict(
      w1=0.1 * jax.random.normal(ks[0], (out_channels, in_channels, kernel_size), jnp.float32),
      b1=0.1 * jax.random.normal(ks[1], (out_channels,), jnp.float32),
      w2=0.1 * jax.random.normal(ks[2], (out_channels, out_channels, kernel_size), jnp.float32),
      b2=0.1 * jax.random.normal(ks[3], (out_channels,), jnp.float32),
      wsk=0.1 * jax.random.normal(ks[4], (out_channels, in_channels, 1), jnp.float32),
      bsk=0.1 * jax.random.normal(ks[5], (out_channels,), jnp.float32),
      g1=jnp.ones((out_channels,), jnp.float32),
      be1=jnp.zeros((out_channels,), jnp.float32),
      g2=jnp.ones((out_channels,), jnp.float32),
      be2=jnp.zeros((out_channels,), jnp.float32),
  )


def _ref_forward(x_ncl, p, *, kernel_size=5, apply_pooling=False, eps=1e-5):
  pad = kernel_size // 2
  dn = ('NCH', 'OIH', 'NCH')

  def conv(x, w, b, padding):
    y = jax.lax.conv_general_dilated(x, w, window_strides=(1,),
                                     padding=padding, dimension_numbers=dn)
    return y + b[None, :, None]

  def bn(y, g, be):
    mu = jnp.mean(y, axis=(0, 2), keepdims=True)
    var = jnp.mean((y - mu) ** 2, axis=(0, 2), keepdims=True)
    return (y - mu) * jax.lax.rsqrt(var + eps) * g[None, :, None] + be[None, :, None]

  out = conv(x_ncl, p['w1'], p['b1'], [(pad, pad)])
  out = jax.nn.relu(bn(out, p['g1'], p['be1']))
  out = conv(out, p['w2'], p['b2'], [(pad, pad)])
  out = bn(out, p['g2'], p['be2'])
  identity = conv(x_ncl, p['wsk'], p['bsk'], [(0, 0)])
  if apply_pooling:
    out = jax.lax.reduce_window(out, -jnp.inf, jax.lax.max, (1, 1, 2), (1, 1, 2), 'VALID')
    identity = jax.lax.reduce_window(identity, -jnp.inf, jax.lax.max, (1, 1, 2), (1, 1, 2), 'VALID')
  return jax.nn.relu(out + identity)


if __name__ == "__main__":
  key = jax.random.PRNGKey(0)
  kx, kp = jax.random.split(key)
  N, Cin, Cout, L, K = 2, 4, 8, 16, 5

  x = jax.random.normal(kx, (N, Cin, L), jnp.float32)   # PyTorch Conv1d NCL input
  params = init_params(kp, Cin, Cout, K)
  ref = _ref_forward(x, params, kernel_size=K, apply_pooling=False)

  # f32 MXU / f32 intermediates: tight check against the pure-JAX reference.
  prep_f32 = prepare_params(params, mxu_dtype=jnp.float32)
  out_f32 = jax.block_until_ready(
      residual_block_forward(x, prep_f32, out_channels=Cout, kernel_size=K,
                             apply_pooling=False))
  assert out_f32.shape == (N, Cout, L), out_f32.shape
  assert jnp.allclose(out_f32, ref, rtol=2e-4, atol=2e-4), \
      float(jnp.max(jnp.abs(out_f32 - ref)))

  # bf16 MXU + bf16 inter-stage activations (production default).
  prep_bf16 = prepare_params(params, mxu_dtype=jnp.bfloat16)
  out_bf16 = jax.block_until_ready(
      residual_block_forward(x, prep_bf16, out_channels=Cout, kernel_size=K,
                             apply_pooling=False))
  assert out_bf16.shape == (N, Cout, L), out_bf16.shape
  assert jnp.allclose(out_bf16, ref, rtol=1e-1, atol=1e-1), \
      float(jnp.max(jnp.abs(out_bf16 - ref)))

  print("KERNEL_OK")
</pallas_src>

<mosaic_0001>
module attributes {stable_mosaic.version = 11 : i64} {
  func.func @_stage_a_kernel(%arg0: i32, %arg1: memref<2x16x4xf32, #tpu.memory_space<vmem>>, %arg2: memref<640x128xf32, #tpu.memory_space<vmem>>, %arg3: memref<2x16x128xf32, #tpu.memory_space<vmem>>, %arg4: memref<1x2x128xf32, #tpu.memory_space<vmem>>) attributes {dimension_semantics = [#tpu.dimension_semantics<parallel>], iteration_bounds = array<i64: 1>, scalar_prefetch = 0 : i64, scratch_operands = 0 : i64, tpu.core_type = #tpu.core_type<tc>, window_params = [{transform_indices = @transform_0, window_bounds = array<i64: 2, 16, 4>}, {pipeline_mode = #tpu.pipeline_mode<synchronous>, transform_indices = @transform_1, window_bounds = array<i64: 640, 128>}, {transform_indices = @transform_2, window_bounds = array<i64: 2, 16, 128>}, {transform_indices = @transform_3, window_bounds = array<i64: 1, 2, 128>}]} {
    %c0 = arith.constant 0 : index
    %c0_0 = arith.constant 0 : index
    %c0_1 = arith.constant 0 : index
    %0 = vector.load %arg1[%c0, %c0_0, %c0_1] : memref<2x16x4xf32, #tpu.memory_space<vmem>>, vector<2x16x4xf32>
    %cst = arith.constant 0.000000e+00 : f32
    %1 = vector.broadcast %cst : f32 to vector<2x16x124xf32>
    %2 = tpu.concatenate %0, %1 in 2 : vector<2x16x4xf32>, vector<2x16x124xf32> -> vector<2x16x128xf32>
    %cst_2 = arith.constant 0.000000e+00 : f32
    %3 = vector.broadcast %cst_2 : f32 to vector<2x2x128xf32>
    %4 = tpu.concatenate %3, %2, %3 in 1 : vector<2x2x128xf32>, vector<2x16x128xf32>, vector<2x2x128xf32> -> vector<2x20x128xf32>
    %5 = vector.extract_strided_slice %4 {offsets = [0, 0, 0], sizes = [2, 16, 128], strides = [1, 1, 1]} : vector<2x20x128xf32> to vector<2x16x128xf32>
    %6 = vector.extract_strided_slice %4 {offsets = [0, 1, 0], sizes = [2, 16, 128], strides = [1, 1, 1]} : vector<2x20x128xf32> to vector<2x16x128xf32>
    %7 = tpu.concatenate %5, %6 in 2 : vector<2x16x128xf32>, vector<2x16x128xf32> -> vector<2x16x256xf32>
    %8 = vector.shape_cast %7 : vector<2x16x256xf32> to vector<32x256xf32>
    %c0_3 = arith.constant 0 : index
    %c0_4 = arith.constant 0 : index
    %9 = vector.load %arg2[%c0_3, %c0_4] : memref<640x128xf32, #tpu.memory_space<vmem>>, vector<256x128xf32>
    %cst_5 = arith.constant dense<0.000000e+00> : vector<32x128xf32>
    %10 = tpu.matmul %8, %9, %cst_5 {dimension_numbers = #tpu.dot_dimension_numbers<[1], [0], [0], [1], [0, 0, 1, 1], [], []>} : vector<32x256xf32>, vector<256x128xf32>, vector<32x128xf32> -> vector<32x128xf32>
    %11 = vector.extract_strided_slice %4 {offsets = [0, 2, 0], sizes = [2, 16, 128], strides = [1, 1, 1]} : vector<2x20x128xf32> to vector<2x16x128xf32>
    %12 = vector.extract_strided_slice %4 {offsets = [0, 3, 0], sizes = [2, 16, 128], strides = [1, 1, 1]} : vector<2x20x128xf32> to vector<2x16x128xf32>
    %13 = tpu.concatenate %11, %12 in 2 : vector<2x16x128xf32>, vector<2x16x128xf32> -> vector<2x16x256xf32>
    %14 = vector.shape_cast %13 : vector<2x16x256xf32> to vector<32x256xf32>
    %c256 = arith.constant 256 : index
    %c0_6 = arith.constant 0 : index
    %15 = vector.load %arg2[%c256, %c0_6] : memref<640x128xf32, #tpu.memory_space<vmem>>, vector<256x128xf32>
    %cst_7 = arith.constant dense<0.000000e+00> : vector<32x128xf32>
    %16 = tpu.matmul %14, %15, %cst_7 {dimension_numbers = #tpu.dot_dimension_numbers<[1], [0], [0], [1], [0, 0, 1, 1], [], []>} : vector<32x256xf32>, vector<256x128xf32>, vector<32x128xf32> -> vector<32x128xf32>
    %17 = arith.addf %10, %16 : vector<32x128xf32>
    %18 = vector.extract_strided_slice %4 {offsets = [0, 4, 0], sizes = [2, 16, 128], strides = [1, 1, 1]} : vector<2x20x128xf32> to vector<2x16x128xf32>
    %19 = vector.shape_cast %18 : vector<2x16x128xf32> to vector<32x128xf32>
    %c512 = arith.constant 512 : index
    %c0_8 = arith.constant 0 : index
    %20 = vector.load %arg2[%c512, %c0_8] : memref<640x128xf32, #tpu.memory_space<vmem>>, vector<128x128xf32>
    %cst_9 = arith.constant dense<0.000000e+00> : vector<32x128xf32>
    %21 = tpu.matmul %19, %20, %cst_9 {dimension_numbers = #tpu.dot_dimension_numbers<[1], [0], [0], [1], [0, 0, 1, 1], [], []>} : vector<32x128xf32>, vector<128x128xf32>, vector<32x128xf32> -> vector<32x128xf32>
    %22 = arith.addf %17, %21 : vector<32x128xf32>
    %23 = vector.shape_cast %22 : vector<32x128xf32> to vector<2x16x128xf32>
    %24 = vector.shape_cast %23 : vector<2x16x128xf32> to vector<32x128xf32>
    %cst_10 = arith.constant dense<0.000000e+00> : vector<128xf32>
    %25 = vector.multi_reduction <add>, %24, %cst_10 [0] : vector<32x128xf32> to vector<128xf32>
    %26 = vector.shape_cast %25 : vector<128xf32> to vector<1x128xf32>
    %27 = arith.mulf %24, %24 : vector<32x128xf32>
    %cst_11 = arith.constant dense<0.000000e+00> : vector<128xf32>
    %28 = vector.multi_reduction <add>, %27, %cst_11 [0] : vector<32x128xf32> to vector<128xf32>
    %29 = vector.shape_cast %28 : vector<128xf32> to vector<1x128xf32>
    %30 = tpu.concatenate %26, %29 in 0 : vector<1x128xf32>, vector<1x128xf32> -> vector<2x128xf32>
    %31 = vector.shape_cast %30 : vector<2x128xf32> to vector<1x2x128xf32>
    %c0_12 = arith.constant 0 : index
    %c0_13 = arith.constant 0 : index
    %c0_14 = arith.constant 0 : index
    %32 = vector.load %arg4[%c0_12, %c0_13, %c0_14] : memref<1x2x128xf32, #tpu.memory_space<vmem>>, vector<1x2x128xf32>
    tpu.vector_store %arg4[%c0_12, %c0_13, %c0_14], %31 {strides = array<i32>} : memref<1x2x128xf32, #tpu.memory_space<vmem>>, vector<1x2x128xf32>,
    %c0_15 = arith.constant 0 : index
    %c0_16 = arith.constant 0 : index
    %c0_17 = arith.constant 0 : index
    %33 = vector.load %arg3[%c0_15, %c0_16, %c0_17] : memref<2x16x128xf32, #tpu.memory_space<vmem>>, vector<2x16x128xf32>
    tpu.vector_store %arg3[%c0_15, %c0_16, %c0_17], %23 {strides = array<i32>} : memref<2x16x128xf32, #tpu.memory_space<vmem>>, vector<2x16x128xf32>,
    return
  }
  func.func @transform_0(%arg0: i32) -> (i32, i32, i32) {
    %c0_i32 = arith.constant 0 : i32
    %c0_i32_0 = arith.constant 0 : i32
    %c0_i32_1 = arith.constant 0 : i32
    return %arg0, %c0_i32, %c0_i32_0 : i32, i32, i32
  }
  func.func @transform_1(%arg0: i32) -> (i32, i32) {
    %c0_i32 = arith.constant 0 : i32
    %c0_i32_0 = arith.constant 0 : i32
    %c0_i32_1 = arith.constant 0 : i32
    return %c0_i32, %c0_i32_0 : i32, i32
  }
  func.func @transform_2(%arg0: i32) -> (i32, i32, i32) {
    %c0_i32 = arith.constant 0 : i32
    %c0_i32_0 = arith.constant 0 : i32
    %c0_i32_1 = arith.constant 0 : i32
    return %arg0, %c0_i32, %c0_i32_0 : i32, i32, i32
  }
  func.func @transform_3(%arg0: i32) -> (i32, i32, i32) {
    %c0_i32 = arith.constant 0 : i32
    %c0_i32_0 = arith.constant 0 : i32
    %c0_i32_1 = arith.constant 0 : i32
    return %arg0, %c0_i32, %c0_i32_0 : i32, i32, i32
  }
}

</mosaic_0001>

<bundles_post_ra>
// kernel: tpu_custom_call.1
= control target key start
LH: loop header
LB: loop body
LE: loop exit
PB: predicated region body
PF: predicated region fallthrough
CT: control target
= control target key end

     0   :  { %9 = vsyncpa [#allocation3], 0  ;;  %s1011_s0 = inlined_call_operand.vmem [shape: f32[2,16,4], index: 0, kind: input, shape index: {}]   ;;  %s1012_s1 = inlined_call_operand.hbm [shape: f32[640,128], index: 1, kind: input, shape index: {}]   ;;  %s1013_s2 = inlined_call_operand.hbm [shape: f32[2,16,128], index: 2, kind: output, shape index: {0}]   ;;  %s1014_s3 = inlined_call_operand.hbm [shape: f32[1,2,128], index: 3, kind: output, shape index: {1}]  }
   0x1   :  { %10 = vsyncpa [#allocation4], 0 }
   0x2   :  { %11 = vsyncpa [#allocation7], 0  ;;  %s860_s12 = smov [#allocation2]   ;;  %s788_s16 = scalar_lea.hbm %s1012_s1, 10240 }
   0x3   :  { %s19_s13 = sshll.u32 %s860_s12, 4  ;;  %p789_p0 = scmp.ne.s32.totalorder %s1012_s1, %s788_s16  ;;  %s20_s13 = int_to_ptr.vmem [resolvable:$true] %s19_s13 }
   0x4   :  { %p792_p1 = scmp.lt.u32.totalorder %s788_s16, %s1012_s1 }
   0x6   :  { %p794_p2 = pnand %p792_p1, %p789_p0 }
   0x8   :  { %797 = shalt.err (!%p794_p2)
}
   0x9   :  { %s798_s21 = scalar_lea.vmem %s20_s13, 10240  ;;  %p803_p4 = scmp.lt.s32.totalorder %s20_s13, %s20_s13 }
   0xa   :  { %p799_p3 = scmp.ne.s32.totalorder %s20_s13, %s798_s21  ;;  %p804_p5 = scmp.lt.s32.totalorder %s798_s21, %s798_s21 }
   0xc   :  { %p805_p6 = por %p804_p5, %p803_p4 }
   0xe   :  { %p806_p7 = pnand %p805_p6, %p799_p3 }
  0x10   :  { %809 = shalt.err (!%p806_p7)
}
  0x11   :  { %s861_s22 = smov 128   ;;  %s862_s23 = smov 8  }
  0x12   :  { %25 = dma.hbm_to_vmem [thread:$0]  %s1012_s1, 10240, %s20_s13, [#allocation3], %s861_s22, %s861_s22, %s862_s23  }
  0x13   :  { %854 = dma.done.wait [#allocation3], 10240  }
  0x14   :  { %855 = vsyncadd [#allocation3], 4294957056  ;;  %v155_v0 = vld [vmem:[#allocation2 + $0x180] sm:$0xff]  ;;  %v156_v1 = vld [vmem:[#allocation2 + $0x188] sm:$0xff]  ;;  %vm33_vm0 = vcmask 31744   ;;  %vm42_vm1 = vcmask 1041408  }
  0x15   :  { %v94_v2 = vld [vmem:[#allocation2 + $0x80] sm:$0xff]  ;;  %v671_v3 = vpack.c.bf16 %v156_v1, %v155_v0  ;;  %v95_v4 = vld [vmem:[#allocation2 + $0x88] sm:$0xff]  ;;  %v157_v11 = vld [vmem:[#allocation2 + $0x190] sm:$0xff]  ;;  %vm63_vm2 = vcmask 1046528   ;;  %vm110_vm3 = vcmask 1045504   ;;  %vm341_vm5 = vcmask 1043456  }
  0x16   :  { %v139_v5 = vld [vmem:[#allocation2 + $0x100] sm:$0xff]  ;;  %v140_v6 = vld [vmem:[#allocation2 + $0x108] sm:$0xff]  ;;  %v703_v7 = vpack.c.bf16 %v95_v4, %v94_v2  ;;  %v158_v13 = vld [vmem:[#allocation2 + $0x198] sm:$0xff] }
  0x17   :  { %v673_v8 = vpack.c.bf16 %v140_v6, %v139_v5  ;;  %v78_v9 = vld [vmem:[#allocation2] sm:$0xff]  ;;  %v79_v10 = vld [vmem:[#allocation2 + $0x8] sm:$0xff]  ;;  %672 = vmatprep.subr.bf16.mxu0 %v671_v3  ;;  %v96_v14 = vld [vmem:[#allocation2 + $0x90] sm:$0xff]  ;;  %v675_v16 = vpack.c.bf16 %v158_v13, %v157_v11 }
  0x18   :  { %v705_v12 = vpack.c.bf16 %v79_v10, %v78_v9  ;;  %v97_v15 = vld [vmem:[#allocation2 + $0x98] sm:$0xff]  ;;  %704 = vmatprep.subr.bf16.mxu1 %v703_v7  ;;  %v141_v18 = vld [vmem:[#allocation2 + $0x110] sm:$0xff]  ;;  %v159_v23 = vld [vmem:[#allocation2 + $0x1a0] sm:$0xff] }
  0x19   :  { %674 = vmatpush3.bf16.msra.mxu0 %v673_v8  ;;  %v707_v17 = vpack.c.bf16 %v97_v15, %v96_v14  ;;  %v142_v19 = vld [vmem:[#allocation2 + $0x118] sm:$0xff]  ;;  %v80_v20 = vld [vmem:[#allocation2 + $0x10] sm:$0xff]  ;;  %v160_v24 = vld [vmem:[#allocation2 + $0x1a8] sm:$0xff] }
  0x1a   :  { %706 = vmatpush3.bf16.msra.mxu1 %v705_v12  ;;  %v677_v21 = vpack.c.bf16 %v142_v19, %v141_v18  ;;  %v81_v22 = vld [vmem:[#allocation2 + $0x18] sm:$0xff]  ;;  %676 = vmatprep.subr.bf16.mxu0 %v675_v16  ;;  %v679_v26 = vpack.c.bf16 %v160_v24, %v159_v23  ;;  %v98_v27 = vld [vmem:[#allocation2 + $0xa0] sm:$0xff]  ;;  %v99_v28 = vld [vmem:[#allocation2 + $0xa8] sm:$0xff] }
  0x1b   :  { %708 = vmatprep.subr.bf16.mxu1 %v707_v17  ;;  %v709_v25 = vpack.c.bf16 %v81_v22, %v80_v20  ;;  %v143_v29 = vld [vmem:[#allocation2 + $0x120] sm:$0xff]  ;;  %v711_v30 = vpack.c.bf16 %v99_v28, %v98_v27  ;;  %v144_v31 = vld [vmem:[#allocation2 + $0x128] sm:$0xff]  ;;  %v161_v35 = vld [vmem:[#allocation2 + $0x1b0] sm:$0xff] }
  0x1c   :  { %v82_v32 = vld [vmem:[#allocation2 + $0x20] sm:$0xff]  ;;  %v83_v33 = vld [vmem:[#allocation2 + $0x28] sm:$0xff]  ;;  %v681_v34 = vpack.c.bf16 %v144_v31, %v143_v29  ;;  %v162_v36 = vld [vmem:[#allocation2 + $0x1b8] sm:$0xff] }
  0x1d   :  { %678 = vmatpush3.bf16.msra.mxu0 %v677_v21  ;;  %v100_v37 = vld [vmem:[#allocation2 + $0xb0] sm:$0xff]  ;;  %v713_v38 = vpack.c.bf16 %v83_v33, %v82_v32  ;;  %v683_v39 = vpack.c.bf16 %v162_v36, %v161_v35  ;;  %v101_v40 = vld [vmem:[#allocation2 + $0xb8] sm:$0xff]  ;;  %v163_v46 = vld [vmem:[#allocation2 + $0x1c0] sm:$0xff] }
  0x1e   :  { %710 = vmatpush3.bf16.msra.mxu1 %v709_v25  ;;  %680 = vmatprep.subr.bf16.mxu0 %v679_v26  ;;  %v145_v41 = vld [vmem:[#allocation2 + $0x130] sm:$0xff]  ;;  %v146_v42 = vld [vmem:[#allocation2 + $0x138] sm:$0xff]  ;;  %v715_v43 = vpack.c.bf16 %v101_v40, %v100_v37  ;;  %v164_v47 = vld [vmem:[#allocation2 + $0x1c8] sm:$0xff] }
  0x1f   :  { %712 = vmatprep.subr.bf16.mxu1 %v711_v30  ;;  %v84_v44 = vld [vmem:[#allocation2 + $0x30] sm:$0xff]  ;;  %v85_v45 = vld [vmem:[#allocation2 + $0x38] sm:$0xff]  ;;  %v102_v48 = vld [vmem:[#allocation2 + $0xc0] sm:$0xff]  ;;  %v685_v50 = vpack.c.bf16 %v146_v42, %v145_v41  ;;  %v687_v52 = vpack.c.bf16 %v164_v47, %v163_v46 }
  0x20   :  { %v103_v49 = vld [vmem:[#allocation2 + $0xc8] sm:$0xff]  ;;  %v717_v51 = vpack.c.bf16 %v85_v45, %v84_v44  ;;  %v147_v53 = vld [vmem:[#allocation2 + $0x140] sm:$0xff]  ;;  %v165_v58 = vld [vmem:[#allocation2 + $0x1d0] sm:$0xff] }
  0x21   :  { %682 = vmatpush3.bf16.msra.mxu0 %v681_v34  ;;  %v148_v54 = vld [vmem:[#allocation2 + $0x148] sm:$0xff]  ;;  %v86_v55 = vld [vmem:[#allocation2 + $0x40] sm:$0xff]  ;;  %v719_v56 = vpack.c.bf16 %v103_v49, %v102_v48  ;;  %v166_v59 = vld [vmem:[#allocation2 + $0x1d8] sm:$0xff] }
  0x22   :  { %714 = vmatpush3.bf16.msra.mxu1 %v713_v38  ;;  %684 = vmatprep.subr.bf16.mxu0 %v683_v39  ;;  %v87_v57 = vld [vmem:[#allocation2 + $0x48] sm:$0xff]  ;;  %v104_v60 = vld [vmem:[#allocation2 + $0xd0] sm:$0xff]  ;;  %v105_v61 = vld [vmem:[#allocation2 + $0xd8] sm:$0xff]  ;;  %v689_v62 = vpack.c.bf16 %v148_v54, %v147_v53  ;;  %v691_v0 = vpack.c.bf16 %v166_v59, %v165_v58 }
  0x23   :  { %716 = vmatprep.subr.bf16.mxu1 %v715_v43  ;;  %v721_v63 = vpack.c.bf16 %v87_v57, %v86_v55  ;;  %v149_v1 = vld [vmem:[#allocation2 + $0x150] sm:$0xff]  ;;  %v150_v2 = vld [vmem:[#allocation2 + $0x158] sm:$0xff]  ;;  %v723_v4 = vpack.c.bf16 %v105_v61, %v104_v60  ;;  %v167_v6 = vld [vmem:[#allocation2 + $0x1e0] sm:$0xff] }
  0x24   :  { %v88_v3 = vld [vmem:[#allocation2 + $0x50] sm:$0xff]  ;;  %v89_v5 = vld [vmem:[#allocation2 + $0x58] sm:$0xff]  ;;  %v168_v7 = vld [vmem:[#allocation2 + $0x1e8] sm:$0xff]  ;;  %v693_v10 = vpack.c.bf16 %v150_v2, %v149_v1 }
  0x25   :  { %686 = vmatpush3.bf16.msra.mxu0 %v685_v50  ;;  %v106_v8 = vld [vmem:[#allocation2 + $0xe0] sm:$0xff]  ;;  %v107_v9 = vld [vmem:[#allocation2 + $0xe8] sm:$0xff]  ;;  %v725_v14 = vpack.c.bf16 %v89_v5, %v88_v3  ;;  %v695_v15 = vpack.c.bf16 %v168_v7, %v167_v6  ;;  %v169_v20 = vld [vmem:[#allocation2 + $0x1f0] sm:$0xff] }
  0x26   :  { %718 = vmatpush3.bf16.msra.mxu1 %v717_v51  ;;  %688 = vmatprep.subr.bf16.mxu0 %v687_v52  ;;  %v151_v11 = vld [vmem:[#allocation2 + $0x160] sm:$0xff]  ;;  %v152_v12 = vld [vmem:[#allocation2 + $0x168] sm:$0xff]  ;;  %v727_v19 = vpack.c.bf16 %v107_v9, %v106_v8  ;;  %v170_v21 = vld [vmem:[#allocation2 + $0x1f8] sm:$0xff] }
  0x27   :  { %720 = vmatprep.subr.bf16.mxu1 %v719_v56  ;;  %v90_v13 = vld [vmem:[#allocation2 + $0x60] sm:$0xff]  ;;  %v91_v16 = vld [vmem:[#allocation2 + $0x68] sm:$0xff]  ;;  %v108_v24 = vld [vmem:[#allocation2 + $0xf0] sm:$0xff]  ;;  %v697_v28 = vpack.c.bf16 %v152_v12, %v151_v11  ;;  %v699_v32 = vpack.c.bf16 %v170_v21, %v169_v20 }
  0x28   :  { %v29_v17 = vld [vmem:[%s1011_s0] sm:$0xff]  ;;  %v30_v18 = vld [vmem:[%s1011_s0 + $0x8] sm:$0xff]  ;;  %v109_v25 = vld [vmem:[#allocation2 + $0xf8] sm:$0xff]  ;;  %v729_v29 = vpack.c.bf16 %v91_v16, %v90_v13 }
  0x29   :  { %690 = vmatpush3.bf16.msra.mxu0 %v689_v62  ;;  %v34_v22 = vsel %vm33_vm0, %v29_v17, 0.0  ;;  %v35_v23 = vsel %vm33_vm0, %v30_v18, 0.0  ;;  %v153_v30 = vld [vmem:[#allocation2 + $0x170] sm:$0xff]  ;;  %v154_v31 = vld [vmem:[#allocation2 + $0x178] sm:$0xff]  ;;  %v731_v38 = vpack.c.bf16 %v109_v25, %v108_v24  ;;  %v356_v42 = vld [vmem:[#allocation2 + $0x200] sm:$0xff] }
  0x2a   :  { %722 = vmatpush3.bf16.msra.mxu1 %v721_v63  ;;  %692 = vmatprep.subr.bf16.mxu0 %v691_v0  ;;  %v908_v26 = vrot.slane %v34_v22, 6  ;;  %v44_v27 = vrot.slane %v35_v23, 6  ;;  %v92_v33 = vld [vmem:[#allocation2 + $0x70] sm:$0xff]  ;;  %v93_v34 = vld [vmem:[#allocation2 + $0x78] sm:$0xff]  ;;  %v357_v43 = vld [vmem:[#allocation2 + $0x208] sm:$0xff]  ;;  %v701_v45 = vpack.c.bf16 %v154_v31, %v153_v30 }
  0x2b   :  { %724 = vmatprep.subr.bf16.mxu1 %v723_v4  ;;  %v31_v44 = vld [vmem:[%s1011_s0 + $0x10] sm:$0xff]  ;;  %v32_v47 = vld [vmem:[%s1011_s0 + $0x18] sm:$0xff]  ;;  %v733_v52 = vpack.c.bf16 %v93_v34, %v92_v33  ;;  %v735_v55 = vpack.c.bf16 %v357_v43, %v356_v42  ;;  %vm943_vm4 = vmneg %vm42_vm1  ;;  %s863_s0 = smov [#allocation5]  }
  0x2c   :  { %v912_v35 = vsel %vm42_vm1, %v908_v26, %v44_v27  ;;  %v916_v36 = vsel %vm42_vm1, 0.0, %v908_v26  ;;  %v919_v37 = vsel %vm42_vm1, %v44_v27, 0.0  ;;  %v36_v51 = vsel %vm33_vm0, %v31_v44, 0.0  ;;  %v358_v56 = vld [vmem:[#allocation2 + $0x210] sm:$0xff]  ;;  %v359_v57 = vld [vmem:[#allocation2 + $0x218] sm:$0xff]  ;;  %v360_v7 = vld [vmem:[#allocation2 + $0x220] sm:$0xff] }
  0x2d   :  { %694 = vmatpush3.bf16.msra.mxu0 %v693_v10  ;;  %v64_v39 = vrot.slane %v916_v36, 1  ;;  %v65_v40 = vrot.slane %v912_v35, 1  ;;  %v67_v41 = vrot.slane %v919_v37, 1  ;;  %v111_v46 = vrot.slane %v916_v36, 2  ;;  %v361_v8 = vld [vmem:[#allocation2 + $0x228] sm:$0xff]  ;;  %v362_v20 = vld [vmem:[#allocation2 + $0x230] sm:$0xff] }
  0x2e   :  { %726 = vmatpush3.bf16.msra.mxu1 %v725_v14  ;;  %696 = vmatprep.subr.bf16.mxu0 %v695_v15  ;;  %v112_v50 = vrot.slane %v912_v35, 2  ;;  %v37_v58 = vsel %vm33_vm0, %v32_v47, 0.0  ;;  %v46_v59 = vrot.slane %v36_v51, 6  ;;  %v117_v62 = vrot.slane %v919_v37, 2  ;;  %v363_v21 = vld [vmem:[#allocation2 + $0x238] sm:$0xff]  ;;  %v364_v27 = vld [vmem:[#allocation2 + $0x240] sm:$0xff] }
  0x2f   :  { %728 = vmatprep.subr.bf16.mxu1 %v727_v19  ;;  %v66_v48 = vsel %vm63_vm2, %v64_v39, %v65_v40  ;;  %v68_v49 = vsel %vm63_vm2, %v65_v40, %v67_v41  ;;  %v119_v61 = vrot.slane %v67_v41, 2  ;;  %v47_v63 = vrot.slane %v37_v58, 6  ;;  %v366_v39 = vld [vmem:[#allocation2 + $0x250] sm:$0xff]  ;;  %v367_v40 = vld [vmem:[#allocation2 + $0x258] sm:$0xff]  ;;  %v368_v42 = vld [vmem:[#allocation2 + $0x260] sm:$0xff]  ;;  %s495_s6 = sshll.u32 %s863_s0, 4  ;;  %s496_s6 = int_to_ptr.vmem [resolvable:$true] %s495_s6 }
  0x30   :  { %v114_v53 = vrot.slane %v66_v48, 2  ;;  %v115_v54 = vrot.slane %v68_v49, 2  ;;  %320 = vmatprep.mubr.f32.mxu1 %v66_v48  ;;  %v113_v0 = vsel %vm110_vm3, %v111_v46, %v112_v50  ;;  %v940_v1 = vsel %vm42_vm1, 0.0, %v46_v59  ;;  %v369_v43 = vld [vmem:[#allocation2 + $0x268] sm:$0xff]  ;;  %v371_v46 = vld [vmem:[#allocation2 + $0x278] sm:$0xff]  ;;  %s810_s7 = scalar_lea.vmem %s496_s6, 512  ;;  %p815_p9 = scmp.lt.s32.totalorder %s496_s6, %s496_s6 }
  0x31   :  { %698 = vmatpush3.bf16.msra.mxu0 %v697_v28  ;;  %v739_v3 = vpack.c.bf16 %v359_v57, %v358_v56  ;;  %v948_v4 = vsel %vm42_vm1, %v46_v59, %v47_v63  ;;  %v951_v5 = vsel %vm42_vm1, %v47_v63, 0.0  ;;  %v69_v6 = vrot.slane %v940_v1, 1  ;;  %v365_v28 = vld [vmem:[#allocation2 + $0x248] sm:$0xff]  ;;  %p811_p8 = scmp.ne.s32.totalorder %s496_s6, %s810_s7  ;;  %p816_p10 = scmp.lt.s32.totalorder %s810_s7, %s810_s7 }
  0x32   :  { %730 = vmatpush3.bf16.msra.mxu1 %v729_v29  ;;  %700 = vmatprep.subr.bf16.mxu0 %v699_v32  ;;  %v116_v60 = vsel %vm110_vm3, %v114_v53, %v115_v54  ;;  %v70_v9 = vrot.slane %v948_v4, 1  ;;  %v72_v10 = vrot.slane %v951_v5, 1  ;;  %v120_v11 = vsel %vm110_vm3, %v115_v54, %v119_v61 }
  0x33   :  { %732 = vmatprep.subr.bf16.mxu1 %v731_v38  ;;  %235 = vmatprep.mubr.f32.mxu0 %v116_v60  ;;  %v118_v12 = vsel %vm110_vm3, %v112_v50, %v117_v62  ;;  %v121_v15 = vrot.slane %v940_v1, 2  ;;  %v122_v16 = vrot.slane %v948_v4, 2  ;;  %v743_v17 = vpack.c.bf16 %v361_v8, %v360_v7  ;;  %p817_p11 = por %p816_p10, %p815_p9 }
  0x34   :  { %v71_v13 = vsel %vm63_vm2, %v69_v6, %v70_v9  ;;  %v73_v14 = vsel %vm63_vm2, %v70_v9, %v72_v10  ;;  %v129_v23 = vrot.slane %v72_v10, 2  ;;  %v127_v25 = vrot.slane %v951_v5, 2 }
  0x35   :  { %702 = vmatpush3.bf16.msra.mxu0 %v701_v45  ;;  %v124_v18 = vrot.slane %v71_v13, 2  ;;  %v125_v19 = vrot.slane %v73_v14, 2  ;;  %v123_v24 = vsel %vm110_vm3, %v121_v15, %v122_v16  ;;  %v342_v30 = vrot.slane %v916_v36, 4  ;;  %v370_v45 = vld [vmem:[#allocation2 + $0x270] sm:$0xff]  ;;  %p818_p12 = pnand %p817_p11, %p811_p8 }
  0x36   :  { %734 = vmatpush3.bf16.msra.mxu1 %v733_v52  ;;  %736 = vmatprep.subr.bf16.mxu0 %v735_v55  ;;  %v343_v31 = vrot.slane %v912_v35, 4  ;;  %v128_v32 = vsel %vm110_vm3, %v122_v16, %v127_v25  ;;  %v347_v33 = vrot.slane %v940_v1, 4  ;;  %v348_v34 = vrot.slane %v948_v4, 4 }
  0x37   :  { %767 = vmatprep.subr.bf16.mxu1 %v735_v55  ;;  %v126_v22 = vsel %vm110_vm3, %v124_v18, %v125_v19  ;;  %v130_v29 = vsel %vm110_vm3, %v125_v19, %v129_v23  ;;  %v751_v38 = vpack.c.bf16 %v365_v28, %v364_v27  ;;  %v755_v41 = vpack.c.bf16 %v367_v40, %v366_v39 }
  0x38   :  { %236 = vmatmul.mubr.f32.vlgmr.msra.gmra.mrb[0].mxu0 %v113_v0  ;;  %v349_v36 = vsel %vm341_vm5, %v347_v33, %v348_v34  ;;  %v759_v44 = vpack.c.bf16 %v369_v43, %v368_v42  ;;  %v763_v47 = vpack.c.bf16 %v371_v46, %v370_v45  ;;  %v345_v48 = vrot.slane %v919_v37, 4 }
  0x39   :  { %522 = vmatmul.mubr.msk.f32.vlgmr.msra.gmra.mrb[0].mxu1 %vm943_vm4, %v908_v26  ;;  %738 = vmatpush3.bf16.msra.mxu0 %v735_v55  ;;  %v747_v26 = vpack.c.bf16 %v363_v21, %v362_v20 }
  0x3a   :  { %775 = vmatpush3.bf16.msra.mxu1 %v735_v55  ;;  %740 = vmatprep.subr.bf16.mxu0 %v739_v3  ;;  %v346_v50 = vsel %vm341_vm5, %v343_v31, %v345_v48 }
  0x3b   :  { %768 = vmatprep.subr.bf16.mxu1 %v739_v3  ;;  %240 = vmatprep.mubr.f32.mxu0 %v120_v11 }
  0x3c   :  { %325 = vmatprep.mubr.f32.mxu1 %v68_v49  ;;  %241 = vmatmul.mubr.f32.gmra.mrb[2].mxu0 %v118_v12  ;;  %v350_v49 = vrot.slane %v951_v5, 4 }
  0x3d   :  { %742 = vmatpush3.bf16.msra.mxu0 %v739_v3  ;;  %326 = vmatmul.mubr.f32.gmra.mrb[2].mxu1 %v912_v35  ;;  %v344_v35 = vsel %vm341_vm5, %v342_v30, %v343_v31 }
  0x3e   :  { %776 = vmatpush3.bf16.msra.mxu1 %v739_v3  ;;  %744 = vmatprep.subr.bf16.mxu0 %v743_v17  ;;  %v351_v51 = vsel %vm341_vm5, %v348_v34, %v350_v49 }
  0x3f   :  { %769 = vmatprep.subr.bf16.mxu1 %v743_v17  ;;  %245 = vmatprep.mubr.f32.mxu0 %v126_v22 }
  0x40   :  { %330 = vmatprep.mubr.f32.mxu1 %v71_v13  ;;  %246 = vmatmul.mubr.f32.gmra.mrb[4].mxu0 %v123_v24 }
  0x41   :  { %746 = vmatpush3.bf16.msra.mxu0 %v743_v17  ;;  %524 = vmatmul.mubr.msk.f32.gmra.mrb[4].mxu1 %vm943_vm4, %v46_v59 }
  0x42   :  { %777 = vmatpush3.bf16.msra.mxu1 %v743_v17  ;;  %748 = vmatprep.subr.bf16.mxu0 %v747_v26 }
  0x43   :  { %770 = vmatprep.subr.bf16.mxu1 %v747_v26  ;;  %250 = vmatprep.mubr.f32.mxu0 %v130_v29 }
  0x44   :  { %335 = vmatprep.mubr.f32.mxu1 %v73_v14  ;;  %251 = vmatmul.mubr.f32.gmra.mrb[6].mxu0 %v128_v32 }
  0x45   :  { %750 = vmatpush3.bf16.msra.mxu0 %v747_v26  ;;  %336 = vmatmul.mubr.f32.gmra.mrb[6].mxu1 %v948_v4 }
  0x46   :  { %778 = vmatpush3.bf16.msra.mxu1 %v747_v26  ;;  %752 = vmatprep.subr.bf16.mxu0 %v751_v38 }
  0x47   :  { %771 = vmatprep.subr.bf16.mxu1 %v751_v38  ;;  %665 = vmatprep.mubr.f32.mxu0 %v344_v35 }
  0x48   :  { %668 = vmatprep.mubr.f32.mxu1 %v349_v36 }
  0x49   :  { %754 = vmatpush3.bf16.msra.mxu0 %v751_v38 }
  0x4a   :  { %779 = vmatpush3.bf16.msra.mxu1 %v751_v38  ;;  %756 = vmatprep.subr.bf16.mxu0 %v755_v41 }
  0x4b   :  { %772 = vmatprep.subr.bf16.mxu1 %v755_v41 }
  0x4d   :  { %758 = vmatpush3.bf16.msra.mxu0 %v755_v41 }
  0x4e   :  { %780 = vmatpush3.bf16.msra.mxu1 %v755_v41  ;;  %760 = vmatprep.subr.bf16.mxu0 %v759_v44 }
  0x4f   :  { %773 = vmatprep.subr.bf16.mxu1 %v759_v44 }
  0x51   :  { %762 = vmatpush3.bf16.msra.mxu0 %v759_v44 }
  0x52   :  { %781 = vmatpush3.bf16.msra.mxu1 %v759_v44  ;;  %764 = vmatprep.subr.bf16.mxu0 %v763_v47 }
  0x53   :  { %774 = vmatprep.subr.bf16.mxu1 %v763_v47 }
  0x55   :  { %766 = vmatpush3.bf16.msra.mxu0 %v763_v47 }
  0x56   :  { %782 = vmatpush3.bf16.msra.mxu1 %v763_v47 }
  0x58   :  { %666 = vmatmul.mubr.f32.vlgmr.msra.gmra.mrb[8].mxu0 %v346_v50 }
  0x59   :  { %669 = vmatmul.mubr.f32.vlgmr.msra.gmra.mrb[8].mxu1 %v351_v51 }
 0x10b   :  { %v557_v52 = vpop.f32.mrb[0].mxu0 }
 0x10c   :  { %v601_v53 = vpop.f32.mrb[0].mxu1  ;;  %v558_v54 = vpop.f32.mrb[1].mxu0 }
 0x10d   :  { %v559_v55 = vadd.f32 %v558_v54, %v557_v52  ;;  %v602_v56 = vpop.f32.mrb[1].mxu1 }
 0x10e   :  { %v603_v57 = vadd.f32 %v602_v56, %v601_v53 }
 0x10f   :  { %v560_v37 = vpop.f32.mrb[2].mxu0 }
 0x110   :  { %v604_v58 = vpop.f32.mrb[2].mxu1  ;;  %v561_v59 = vpop.f32.mrb[3].mxu0  ;;  %v323_v60 = vadd.f32 %v603_v57, %v559_v55 }
 0x111   :  { %v562_v61 = vadd.f32 %v561_v59, %v560_v37  ;;  %v605_v62 = vpop.f32.mrb[3].mxu1 }
 0x112   :  { %v606_v63 = vadd.f32 %v605_v62, %v604_v58 }
 0x113   :  { %v563_v0 = vpop.f32.mrb[4].mxu0 }
 0x114   :  { %v607_v1 = vpop.f32.mrb[4].mxu1  ;;  %v564_v2 = vpop.f32.mrb[5].mxu0  ;;  %v328_v3 = vadd.f32 %v606_v63, %v562_v61 }
 0x115   :  { %v565_v4 = vadd.f32 %v564_v2, %v563_v0  ;;  %v608_v5 = vpop.f32.mrb[5].mxu1 }
 0x116   :  { %v609_v6 = vadd.f32 %v608_v5, %v607_v1 }
 0x117   :  { %v566_v7 = vpop.f32.mrb[6].mxu0 }
 0x118   :  { %v610_v8 = vpop.f32.mrb[6].mxu1  ;;  %v567_v9 = vpop.f32.mrb[7].mxu0  ;;  %v333_v10 = vadd.f32 %v609_v6, %v565_v4 }
 0x119   :  { %v568_v11 = vadd.f32 %v567_v9, %v566_v7  ;;  %v611_v12 = vpop.f32.mrb[7].mxu1 }
 0x11a   :  { %v612_v13 = vadd.f32 %v611_v12, %v610_v8 }
 0x11c   :  { %v338_v14 = vadd.f32 %v612_v13, %v568_v11 }
 0x12b   :  { %v667_v15 = vpop.f32.mrb[8].mxu0 }
 0x12c   :  { %v458_v16 = vadd.f32 %v667_v15, %v328_v3  ;;  %v670_v17 = vpop.f32.mrb[8].mxu1  ;;  %v438_v18 = vpop.f32.mrb[9].mxu0 }
 0x12d   :  { %v460_v19 = vadd.f32 %v670_v17, %v338_v14  ;;  %v457_v20 = vadd.f32 %v438_v18, %v323_v60  ;;  %v448_v21 = vpop.f32.mrb[9].mxu1 }
 0x12e   :  { %v471_v22 = vmul.f32 %v458_v16, %v458_v16  ;;  %487 = vst [vmem:[#allocation5 + $0x8] sm:$0xff] %v458_v16  ;;  %v459_v23 = vadd.f32 %v448_v21, %v333_v10 }
 0x12f   :  { %489 = vst [vmem:[#allocation5 + $0x18] sm:$0xff] %v460_v19  ;;  %v461_v24 = vadd.f32 %v458_v16, %v457_v20  ;;  %v470_v25 = vmul.f32 %v457_v20, %v457_v20  ;;  %486 = vst [vmem:[#allocation5] sm:$0xff] %v457_v20 }
 0x130   :  { %488 = vst [vmem:[#allocation5 + $0x10] sm:$0xff] %v459_v23  ;;  %v472_v28 = vmul.f32 %v459_v23, %v459_v23 }
 0x131   :  { %v474_v26 = vadd.f32 %v471_v22, %v470_v25  ;;  %v462_v27 = vadd.f32 %v461_v24, %v459_v23 }
 0x132   :  { %821 = shalt.err (!%p818_p12)
}
 0x133   :  { %s822_s10 = scalar_lea.hbm %s1013_s2, 512 }
 0x134   :  { %p823_p13 = scmp.ne.s32.totalorder %s1013_s2, %s822_s10  ;;  %p826_p0 = scmp.lt.u32.totalorder %s822_s10, %s1013_s2 }
 0x136   :  { %p828_p1 = pnand %p826_p0, %p823_p13 }
 0x138   :  { %831 = shalt.err (!%p828_p1)
}
 0x139   :  { %501 = dma.vmem_to_hbm [thread:$0]  %s496_s6, 512, %s1013_s2, [#allocation4], %s861_s22, %s861_s22, %s862_s23   ;;  %v473_v29 = vmul.f32 %v460_v19, %v460_v19  ;;  %v463_v30 = vadd.f32 %v462_v27, %v460_v19  ;;  %v475_v31 = vadd.f32 %v474_v26, %v472_v28  ;;  %vm483_vm6 = vcmask 1040384  }
 0x13a   :  { %s864_s17 = smov [#allocation6]  }
 0x13b   :  { %v464_v32 = vrot.slane %v463_v30, 4  ;;  %v476_v33 = vadd.f32 %v475_v31, %v473_v29  ;;  %s508_s18 = sshll.u32 %s864_s17, 4  ;;  %s509_s18 = int_to_ptr.vmem [resolvable:$true] %s508_s18 }
 0x13c   :  { %s832_s2 = scalar_lea.vmem %s509_s18, 32  ;;  %p837_p3 = scmp.lt.s32.totalorder %s509_s18, %s509_s18 }
 0x13d   :  { %v465_v34 = vadd.f32 %v464_v32, %v463_v30  ;;  %v477_v38 = vrot.slane %v476_v33, 4  ;;  %p833_p2 = scmp.ne.s32.totalorder %s509_s18, %s832_s2  ;;  %p838_p4 = scmp.lt.s32.totalorder %s832_s2, %s832_s2 }
 0x13f   :  { %v466_v39 = vrot.slane %v465_v34, 2  ;;  %v478_v40 = vadd.f32 %v477_v38, %v476_v33  ;;  %p839_p5 = por %p838_p4, %p837_p3 }
 0x141   :  { %v467_v35 = vadd.f32 %v466_v39, %v465_v34  ;;  %v479_v36 = vrot.slane %v478_v40, 2  ;;  %p840_p6 = pnand %p839_p5, %p833_p2 }
 0x143   :  { %v468_v41 = vrot.slane %v467_v35, 1  ;;  %v480_v42 = vadd.f32 %v479_v36, %v478_v40 }
 0x145   :  { %v481_v43 = vrot.slane %v480_v42, 1  ;;  %v469_v44 = vadd.f32 %v468_v41, %v467_v35 }
 0x147   :  { %v482_v45 = vadd.f32 %v481_v43, %v480_v42 }
 0x149   :  { %v484_v46 = vsel %vm483_vm6, %v469_v44, %v482_v45 }
 0x14a   :  { %485 = vst [vmem:[#allocation6] sm:$0x3] %v484_v46 }
 0x14b   :  { %843 = shalt.err (!%p840_p6)
}
 0x14c   :  { %s844_s21 = scalar_lea.hbm %s1014_s3, 32 }
 0x14d   :  { %p845_p7 = scmp.ne.s32.totalorder %s1014_s3, %s844_s21  ;;  %p848_p8 = scmp.lt.u32.totalorder %s844_s21, %s1014_s3 }
 0x14f   :  { %p850_p9 = pnand %p848_p8, %p845_p7 }
 0x151   :  { %853 = shalt.err (!%p850_p9)
}
 0x152   :  { %511 = dma.vmem_to_hbm [thread:$0]  %s509_s18, 32, %s1014_s3, [#allocation7]  }
 0x153   :  { %856 = dma.done.wait [#allocation4], 512  }
 0x154   :  { %857 = vsyncadd [#allocation4], 4294966784 }
 0x155   :  { %858 = dma.done.wait [#allocation7], 32  }
 0x156   :  { %859 = vsyncadd [#allocation7], 4294967264 }
 0x157   :  { %518 = vsyncpa [#allocation3], 1 }
 0x158   :  { %519 = vsyncpa [#allocation4], 1 }
 0x159   :  { %520 = vsyncpa [#allocation7], 1 }

</bundles_post_ra>
